<compile_context>
chip_gen: v7x
topology: tpu7x:2x2x1
jax: 0.10.0
libtpu: 0.0.40
codegen_flags: <defaults>
</compile_context>

<pallas_src>
import jax
import jax.numpy as jnp
from jax.experimental import pallas as pl
from jax.experimental.pallas import tpu as pltpu

BATCH = 8
IN_FEATURES = 32
HIDDEN = 64
NUM_CLASSES = 10
RAND_SIZE = 10
LANE = 128  # TPU lane width: pad every matmul dim to this.


def _mlp_kernel(x_ref, w1_ref, w2_ref, out_ref):
    """Fused 2-layer MLP; biases pre-folded into the padded weights.

    x_ref : (BATCH, 128)  cols [0,32)=features, col 32 = 1.0, rest 0
    w1_ref: (128, 128)    [0:32,0:64)=W1, row 32[:64]=b1, [32,64]=1.0, rest 0
    w2_ref: (128, 128)    [0:64,0:10)=W2, row 64[:10]=b2, rest 0
    out_ref:(BATCH, 128)  cols [0,10)=logits, rest 0
    """
    h = jnp.dot(x_ref[...], w1_ref[...], preferred_element_type=jnp.float32)
    h = jnp.maximum(h, 0.0)  # ReLU; the folded 1.0 bias-carrier stays 1.0
    o = jnp.dot(h, w2_ref[...], preferred_element_type=jnp.float32)
    out_ref[...] = o.astype(out_ref.dtype)


def mlp_forward(xp, w1p, w2p):
    """Single-shot (grid-less) Pallas call.

    The whole problem (~130 KiB) fits in VMEM, so every operand is a
    whole-array VMEM block and the output last dim is a full 128-lane slab
    (unmasked stores). No grid => no per-step pipeline machinery.
    """
    batch = xp.shape[0]
    flops = 2 * 2 * batch * LANE * LANE           # two (B,128)x(128,128) matmuls
    bytes_accessed = 4 * (xp.size + w1p.size + w2p.size + batch * LANE)
    return pl.pallas_call(
        _mlp_kernel,
        out_shape=jax.ShapeDtypeStruct((batch, LANE), jnp.float32),
        in_specs=[
            pl.BlockSpec(memory_space=pltpu.VMEM),
            pl.BlockSpec(memory_space=pltpu.VMEM),
            pl.BlockSpec(memory_space=pltpu.VMEM),
        ],
        out_specs=pl.BlockSpec(memory_space=pltpu.VMEM),
        cost_estimate=pl.CostEstimate(
            flops=flops, transcendentals=0, bytes_accessed=bytes_accessed),
    )(xp, w1p, w2p)


def init_params(key):
    """Deterministic PyTorch-style (uniform fan-in) init of the raw params."""
    k1, k2, k3, k4 = jax.random.split(key, 4)
    bound1 = 1.0 / (IN_FEATURES ** 0.5)
    bound2 = 1.0 / (HIDDEN ** 0.5)
    w1 = jax.random.uniform(k1, (IN_FEATURES, HIDDEN), jnp.float32, -bound1, bound1)
    b1 = jax.random.uniform(k2, (HIDDEN,), jnp.float32, -bound1, bound1)
    w2 = jax.random.uniform(k3, (HIDDEN, NUM_CLASSES), jnp.float32, -bound2, bound2)
    b2 = jax.random.uniform(k4, (NUM_CLASSES,), jnp.float32, -bound2, bound2)
    return w1, b1, w2, b2


def pack_params(w1, b1, w2, b2):
    """Host-side, done once: pad weights to 128x128 and fold the biases in.

    Layer 1: x gets a ones column at index IN_FEATURES, so row IN_FEATURES of
    w1p carries b1; entry [IN_FEATURES, HIDDEN]=1.0 forwards a 1.0 into the
    hidden activation (ReLU(1)=1), which then multiplies row HIDDEN of w2p
    (= b2) in layer 2. All padding is zeros, so the math is exact.
    """
    w1p = jnp.zeros((LANE, LANE), jnp.float32)
    w1p = w1p.at[:IN_FEATURES, :HIDDEN].set(w1)
    w1p = w1p.at[IN_FEATURES, :HIDDEN].set(b1)
    w1p = w1p.at[IN_FEATURES, HIDDEN].set(1.0)
    w2p = jnp.zeros((LANE, LANE), jnp.float32)
    w2p = w2p.at[:HIDDEN, :NUM_CLASSES].set(w2)
    w2p = w2p.at[HIDDEN, :NUM_CLASSES].set(b2)
    return w1p, w2p


@jax.jit
def dict_returning_net(x, packed_params, rand_key):
    w1p, w2p = packed_params
    batch = x.shape[0]
    # Per-call input packing: features | 1.0 bias-carrier | zero pad -> 128 lanes.
    xp = jnp.concatenate(
        [x,
         jnp.ones((batch, 1), x.dtype),
         jnp.zeros((batch, LANE - IN_FEATURES - 1), x.dtype)], axis=1)
    logits = mlp_forward(xp, w1p, w2p)[:, :NUM_CLASSES]
    # torch.randn(10) equivalent — deterministic JAX key stream (see TODO above).
    something_else = jax.random.normal(rand_key, (RAND_SIZE,), jnp.float32)
    return {"logits": logits, "something_else": something_else}


if __name__ == "__main__":
    key = jax.random.PRNGKey(0)
    k_x, k_params, k_rand = jax.random.split(key, 3)

    x = jax.random.normal(k_x, (BATCH, IN_FEATURES), jnp.float32)
    raw = init_params(k_params)            # (w1, b1, w2, b2) for the reference
    packed = pack_params(*raw)             # host-side pad + bias fold, done once

    out = dict_returning_net(x, packed, k_rand)
    jax.block_until_ready(out)

    # Cross-check the hot path against a pure-JAX reference.
    w1, b1, w2, b2 = raw
    ref = jnp.maximum(x @ w1 + b1, 0.0) @ w2 + b2
    assert out["logits"].shape == (BATCH, NUM_CLASSES)
    assert out["something_else"].shape == (RAND_SIZE,)
    assert jnp.allclose(out["logits"], ref, atol=1e-5, rtol=1e-4), (
        float(jnp.max(jnp.abs(out["logits"] - ref))))
    assert bool(jnp.all(jnp.isfinite(out["something_else"])))

    print("KERNEL_OK")
</pallas_src>

<mosaic_0001>
module attributes {stable_mosaic.version = 11 : i64} {
  func.func @_mlp_kernel(%arg0: memref<8x128xf32, #tpu.memory_space<vmem>>, %arg1: memref<128x128xf32, #tpu.memory_space<vmem>>, %arg2: memref<128x128xf32, #tpu.memory_space<vmem>>, %arg3: memref<8x128xf32, #tpu.memory_space<vmem>>) attributes {dimension_semantics = [], scalar_prefetch = 0 : i64, scratch_operands = 0 : i64, tpu.core_type = #tpu.core_type<tc>} {
    %c0 = arith.constant 0 : index
    %c0_0 = arith.constant 0 : index
    %0 = vector.load %arg0[%c0, %c0_0] : memref<8x128xf32, #tpu.memory_space<vmem>>, vector<8x128xf32>
    %c0_1 = arith.constant 0 : index
    %c0_2 = arith.constant 0 : index
    %1 = vector.load %arg1[%c0_1, %c0_2] : memref<128x128xf32, #tpu.memory_space<vmem>>, vector<128x128xf32>
    %cst = arith.constant dense<0.000000e+00> : vector<8x128xf32>
    %2 = tpu.matmul %0, %1, %cst {dimension_numbers = #tpu.dot_dimension_numbers<[1], [0], [0], [1], [0, 0, 1, 1], [], []>} : vector<8x128xf32>, vector<128x128xf32>, vector<8x128xf32> -> vector<8x128xf32>
    %cst_3 = arith.constant 0.000000e+00 : f32
    %3 = vector.broadcast %cst_3 : f32 to vector<8x128xf32>
    %4 = arith.maximumf %2, %3 : vector<8x128xf32>
    %c0_4 = arith.constant 0 : index
    %c0_5 = arith.constant 0 : index
    %5 = vector.load %arg2[%c0_4, %c0_5] : memref<128x128xf32, #tpu.memory_space<vmem>>, vector<128x128xf32>
    %cst_6 = arith.constant dense<0.000000e+00> : vector<8x128xf32>
    %6 = tpu.matmul %4, %5, %cst_6 {dimension_numbers = #tpu.dot_dimension_numbers<[1], [0], [0], [1], [0, 0, 1, 1], [], []>} : vector<8x128xf32>, vector<128x128xf32>, vector<8x128xf32> -> vector<8x128xf32>
    %c0_7 = arith.constant 0 : index
    %c0_8 = arith.constant 0 : index
    %7 = vector.load %arg3[%c0_7, %c0_8] : memref<8x128xf32, #tpu.memory_space<vmem>>, vector<8x128xf32>
    tpu.vector_store %arg3[%c0_7, %c0_8], %6 {strides = array<i32>} : memref<8x128xf32, #tpu.memory_space<vmem>>, vector<8x128xf32>,
    return
  }
}

</mosaic_0001>

<bundles_post_ra>
// kernel: dict_returning_net.1
= control target key start
LH: loop header
LB: loop body
LE: loop exit
PB: predicated region body
PF: predicated region fallthrough
CT: control target
= control target key end

     0   :  { %8 = vsyncpa [#allocation3], 0  ;;  %s549_s0 = inlined_call_operand.vmem [shape: f32[8,128], index: 0, kind: input, shape index: {}]   ;;  %s550_s1 = inlined_call_operand.hbm [shape: f32[128,128], index: 1, kind: input, shape index: {}]   ;;  %s551_s2 = inlined_call_operand.hbm [shape: f32[128,128], index: 2, kind: input, shape index: {}]   ;;  %s552_s3 = inlined_call_operand.hbm [shape: f32[8,128], index: 3, kind: output, shape index: {}]  }
   0x1   :  { %9 = vsyncpa [#allocation6], 0 }
   0x2   :  { %10 = vsyncpa [#allocation4], 0  ;;  %s466_s12 = smov [#allocation2]   ;;  %s394_s16 = scalar_lea.hbm %s550_s1, 2048 }
   0x3   :  { %s18_s13 = sshll.u32 %s466_s12, 4  ;;  %p395_p0 = scmp.ne.s32.totalorder %s550_s1, %s394_s16  ;;  %s19_s13 = int_to_ptr.vmem [resolvable:$true] %s18_s13 }
   0x4   :  { %p398_p1 = scmp.lt.u32.totalorder %s394_s16, %s550_s1 }
   0x6   :  { %p400_p2 = pnand %p398_p1, %p395_p0 }
   0x8   :  { %403 = shalt.err (!%p400_p2)
}
   0x9   :  { %s404_s21 = scalar_lea.vmem %s19_s13, 2048  ;;  %p409_p4 = scmp.lt.s32.totalorder %s19_s13, %s19_s13 }
   0xa   :  { %p405_p3 = scmp.ne.s32.totalorder %s19_s13, %s404_s21  ;;  %p410_p5 = scmp.lt.s32.totalorder %s404_s21, %s404_s21 }
   0xc   :  { %p411_p6 = por %p410_p5, %p409_p4 }
   0xe   :  { %p412_p7 = pnand %p411_p6, %p405_p3 }
  0x10   :  { %415 = shalt.err (!%p412_p7)
}
  0x11   :  { %s467_s22 = smov 128   ;;  %s468_s23 = smov 8  }
  0x12   :  { %24 = dma.hbm_to_vmem [thread:$0]  %s550_s1, 2048, %s19_s13, [#allocation3], %s467_s22, %s467_s22, %s468_s23  }
  0x13   :  { %s469_s26 = smov [#allocation5]   ;;  %s416_s30 = scalar_lea.hbm %s551_s2, 2048 }
  0x14   :  { %s30_s27 = sshll.u32 %s469_s26, 4  ;;  %p417_p8 = scmp.ne.s32.totalorder %s551_s2, %s416_s30  ;;  %s31_s27 = int_to_ptr.vmem [resolvable:$true] %s30_s27 }
  0x15   :  { %p420_p9 = scmp.lt.u32.totalorder %s416_s30, %s551_s2 }
  0x17   :  { %p422_p10 = pnand %p420_p9, %p417_p8 }
  0x19   :  { %425 = shalt.err (!%p422_p10)
}
  0x1a   :  { %s426_s8 = scalar_lea.vmem %s31_s27, 2048  ;;  %p431_p12 = scmp.lt.s32.totalorder %s31_s27, %s31_s27 }
  0x1b   :  { %p427_p11 = scmp.ne.s32.totalorder %s31_s27, %s426_s8  ;;  %p432_p13 = scmp.lt.s32.totalorder %s426_s8, %s426_s8 }
  0x1d   :  { %p433_p0 = por %p432_p13, %p431_p12 }
  0x1f   :  { %p434_p1 = pnand %p433_p0, %p427_p11 }
  0x21   :  { %437 = shalt.err (!%p434_p1)
}
  0x22   :  { %36 = dma.hbm_to_vmem [thread:$0]  %s551_s2, 2048, %s31_s27, [#allocation6], %s467_s22, %s467_s22, %s468_s23  }
  0x23   :  { %460 = dma.done.wait [#allocation3], 2048  }
  0x24   :  { %461 = vsyncadd [#allocation3], 4294965248 }
  0x25   :  { %462 = dma.done.wait [#allocation6], 2048  }
  0x26   :  { %463 = vsyncadd [#allocation6], 4294965248  ;;  %v470_v0 = vmov 0.0|0.0   ;;  %vm471_vm0 = vmmov 0   ;;  %v472_v1 = vmov 0.0   ;;  %v44_v2 = vld [vmem:[#allocation2] sm:$0xff] }
  0x27   :  { %338 = vmatprep.subr.bf16.mxu0 %v470_v0  ;;  %300 = vmatprep.mubr.msk.f32.mxu0 %vm471_vm0, %v472_v1  ;;  %v45_v3 = vld [vmem:[#allocation2 + $0x8] sm:$0xff]  ;;  %v46_v4 = vld [vmem:[#allocation2 + $0x10] sm:$0xff]  ;;  %v47_v6 = vld [vmem:[#allocation2 + $0x18] sm:$0xff]  ;;  %s473_s11 = smov [#allocation7]  }
  0x28   :  { %362 = vmatprep.subr.bf16.mxu1 %v470_v0  ;;  %335 = vmatprep.mubr.msk.f32.mxu1 %vm471_vm0, %v472_v1  ;;  %v339_v5 = vpack.c.bf16 %v45_v3, %v44_v2  ;;  %v342_v7 = vpack.c.bf16 %v47_v6, %v46_v4  ;;  %v48_v8 = vld [vmem:[#allocation2 + $0x20] sm:$0xff]  ;;  %v49_v9 = vld [vmem:[#allocation2 + $0x28] sm:$0xff]  ;;  %v133_v12 = vld [vmem:[#allocation5 + $0x10] sm:$0xff]  ;;  %s224_s12 = sshll.u32 %s473_s11, 4  ;;  %s225_s12 = int_to_ptr.vmem [resolvable:$true] %s224_s12 }
  0x29   :  { %v131_v10 = vld [vmem:[#allocation5] sm:$0xff]  ;;  %v132_v11 = vld [vmem:[#allocation5 + $0x8] sm:$0xff]  ;;  %v134_v13 = vld [vmem:[#allocation5 + $0x18] sm:$0xff]  ;;  %v345_v14 = vpack.c.bf16 %v49_v9, %v48_v8  ;;  %s438_s13 = scalar_lea.vmem %s225_s12, 128  ;;  %p443_p3 = scmp.lt.s32.totalorder %s225_s12, %s225_s12 }
  0x2a   :  { %340 = vmatpush3.bf16.msra.mxu0 %v339_v5  ;;  %v363_v15 = vpack.c.bf16 %v132_v11, %v131_v10  ;;  %v50_v16 = vld [vmem:[#allocation2 + $0x30] sm:$0xff]  ;;  %v51_v17 = vld [vmem:[#allocation2 + $0x38] sm:$0xff]  ;;  %v366_v18 = vpack.c.bf16 %v134_v13, %v133_v12  ;;  %v135_v19 = vld [vmem:[#allocation5 + $0x20] sm:$0xff]  ;;  %p439_p2 = scmp.ne.s32.totalorder %s225_s12, %s438_s13  ;;  %p444_p4 = scmp.lt.s32.totalorder %s438_s13, %s438_s13 }
  0x2b   :  { %341 = vmatprep.subr.bf16.mxu0 %v470_v0  ;;  %v136_v20 = vld [vmem:[#allocation5 + $0x28] sm:$0xff]  ;;  %v348_v21 = vpack.c.bf16 %v51_v17, %v50_v16  ;;  %v52_v22 = vld [vmem:[#allocation2 + $0x40] sm:$0xff]  ;;  %v137_v25 = vld [vmem:[#allocation5 + $0x30] sm:$0xff] }
  0x2c   :  { %364 = vmatpush3.bf16.msra.mxu1 %v363_v15  ;;  %v53_v23 = vld [vmem:[#allocation2 + $0x48] sm:$0xff]  ;;  %v369_v24 = vpack.c.bf16 %v136_v20, %v135_v19  ;;  %v138_v26 = vld [vmem:[#allocation5 + $0x38] sm:$0xff]  ;;  %v54_v28 = vld [vmem:[#allocation2 + $0x50] sm:$0xff]  ;;  %p445_p5 = por %p444_p4, %p443_p3 }
  0x2d   :  { %365 = vmatprep.subr.bf16.mxu1 %v470_v0  ;;  %v351_v27 = vpack.c.bf16 %v53_v23, %v52_v22  ;;  %v55_v29 = vld [vmem:[#allocation2 + $0x58] sm:$0xff]  ;;  %v372_v30 = vpack.c.bf16 %v138_v26, %v137_v25  ;;  %v139_v31 = vld [vmem:[#allocation5 + $0x40] sm:$0xff]  ;;  %v140_v32 = vld [vmem:[#allocation5 + $0x48] sm:$0xff] }
  0x2e   :  { %343 = vmatpush3.bf16.msra.mxu0 %v342_v7  ;;  %v354_v33 = vpack.c.bf16 %v55_v29, %v54_v28  ;;  %v56_v34 = vld [vmem:[#allocation2 + $0x60] sm:$0xff]  ;;  %v57_v35 = vld [vmem:[#allocation2 + $0x68] sm:$0xff]  ;;  %v375_v36 = vpack.c.bf16 %v140_v32, %v139_v31  ;;  %v141_v37 = vld [vmem:[#allocation5 + $0x50] sm:$0xff]  ;;  %p446_p6 = pnand %p445_p5, %p439_p2 }
  0x2f   :  { %344 = vmatprep.subr.bf16.mxu0 %v470_v0  ;;  %v142_v38 = vld [vmem:[#allocation5 + $0x58] sm:$0xff]  ;;  %v357_v39 = vpack.c.bf16 %v57_v35, %v56_v34  ;;  %v58_v40 = vld [vmem:[#allocation2 + $0x70] sm:$0xff]  ;;  %v143_v43 = vld [vmem:[#allocation5 + $0x60] sm:$0xff] }
  0x30   :  { %367 = vmatpush3.bf16.msra.mxu1 %v366_v18  ;;  %v59_v41 = vld [vmem:[#allocation2 + $0x78] sm:$0xff]  ;;  %v378_v42 = vpack.c.bf16 %v142_v38, %v141_v37  ;;  %v144_v44 = vld [vmem:[#allocation5 + $0x68] sm:$0xff]  ;;  %v43_v47 = vld [vmem:[%s549_s0] sm:$0xff] }
  0x31   :  { %368 = vmatprep.subr.bf16.mxu1 %v470_v0  ;;  %v360_v45 = vpack.c.bf16 %v59_v41, %v58_v40  ;;  %v381_v46 = vpack.c.bf16 %v144_v44, %v143_v43  ;;  %v145_v48 = vld [vmem:[#allocation5 + $0x70] sm:$0xff]  ;;  %v146_v49 = vld [vmem:[#allocation5 + $0x78] sm:$0xff] }
  0x32   :  { %346 = vmatpush3.bf16.msra.mxu0 %v345_v14  ;;  %v384_v50 = vpack.c.bf16 %v146_v49, %v145_v48 }
  0x33   :  { %347 = vmatprep.subr.bf16.mxu0 %v470_v0 }
  0x34   :  { %370 = vmatpush3.bf16.msra.mxu1 %v369_v24 }
  0x35   :  { %371 = vmatprep.subr.bf16.mxu1 %v470_v0 }
  0x36   :  { %349 = vmatpush3.bf16.msra.mxu0 %v348_v21 }
  0x37   :  { %350 = vmatprep.subr.bf16.mxu0 %v470_v0 }
  0x38   :  { %373 = vmatpush3.bf16.msra.mxu1 %v372_v30 }
  0x39   :  { %374 = vmatprep.subr.bf16.mxu1 %v470_v0 }
  0x3a   :  { %352 = vmatpush3.bf16.msra.mxu0 %v351_v27 }
  0x3b   :  { %353 = vmatprep.subr.bf16.mxu0 %v470_v0 }
  0x3c   :  { %376 = vmatpush3.bf16.msra.mxu1 %v375_v36 }
  0x3d   :  { %377 = vmatprep.subr.bf16.mxu1 %v470_v0 }
  0x3e   :  { %355 = vmatpush3.bf16.msra.mxu0 %v354_v33 }
  0x3f   :  { %356 = vmatprep.subr.bf16.mxu0 %v470_v0 }
  0x40   :  { %379 = vmatpush3.bf16.msra.mxu1 %v378_v42 }
  0x41   :  { %380 = vmatprep.subr.bf16.mxu1 %v470_v0 }
  0x42   :  { %358 = vmatpush3.bf16.msra.mxu0 %v357_v39 }
  0x43   :  { %359 = vmatprep.subr.bf16.mxu0 %v470_v0 }
  0x44   :  { %382 = vmatpush3.bf16.msra.mxu1 %v381_v46 }
  0x45   :  { %383 = vmatprep.subr.bf16.mxu1 %v470_v0 }
  0x46   :  { %361 = vmatpush3.bf16.msra.mxu0 %v360_v45 }
  0x48   :  { %385 = vmatpush3.bf16.msra.mxu1 %v384_v50 }
  0x49   :  { %301 = vmatmul.mubr.f32.vlgmr.msra.gmra.mrb[0].mxu0 %v43_v47 }
 0x11c   :  { %v126_v51 = vpop.f32.mrb[0].mxu0 }
 0x11d   :  { %v130_v52 = vmax.f32 %v126_v51, 0.0  ;;  %v302_v53 = vpop.f32.mrb[1].mxu0 }
 0x11f   :  { %336 = vmatmul.mubr.f32.vlgmr.msra.gmra.mrb[0].mxu1 %v130_v52 }
 0x1f2   :  { %v213_v54 = vpop.f32.mrb[0].mxu1 }
 0x1f3   :  { %217 = vst [vmem:[#allocation7] sm:$0xff] %v213_v54  ;;  %v337_v55 = vpop.f32.mrb[1].mxu1 }
 0x1f4   :  { %449 = shalt.err (!%p446_p6)
}
 0x1f5   :  { %s450_s15 = scalar_lea.hbm %s552_s3, 128 }
 0x1f6   :  { %p451_p7 = scmp.ne.s32.totalorder %s552_s3, %s450_s15  ;;  %p454_p8 = scmp.lt.u32.totalorder %s450_s15, %s552_s3 }
 0x1f8   :  { %p456_p9 = pnand %p454_p8, %p451_p7 }
 0x1fa   :  { %459 = shalt.err (!%p456_p9)
}
 0x1fb   :  { %227 = dma.vmem_to_hbm [thread:$0]  %s225_s12, 128, %s552_s3, [#allocation4]  }
 0x1fc   :  { %464 = dma.done.wait [#allocation4], 128  }
 0x1fd   :  { %465 = vsyncadd [#allocation4], 4294967168 }
 0x1fe   :  { %231 = vsyncpa [#allocation3], 1 }
 0x1ff   :  { %232 = vsyncpa [#allocation6], 1 }
 0x200   :  { %233 = vsyncpa [#allocation4], 1 }

</bundles_post_ra>
